<compile_context>
chip_gen: v7x
topology: tpu7x:2x2x1
jax: 0.10.0
libtpu: 0.0.40
codegen_flags: <defaults>
</compile_context>

<pallas_src>
import functools

import jax
import jax.numpy as jnp
from jax import lax
from jax.experimental import pallas as pl
from jax.experimental.pallas import tpu as pltpu

EPS = 1e-7
_LANE = 128
_SUBLANE = 8


def _dice_partials_kernel(x_ref, t_ref, out_ref, inter_acc, card_acc, *,
                          x_dtype, rem_last):
    """Accumulates per-(n, c) intersection / cardinality partial sums.

    Grid = (N, S); axis 1 is the spatial reduction axis.  `rem_last` is the
    number of valid lanes in the final spatial block (== t_hw when the block
    shape divides hw exactly, in which case no masking is emitted).
    """
    s = pl.program_id(1)
    last = pl.num_programs(1) - 1

    @pl.when(s == 0)
    def _():
        inter_acc[...] = jnp.zeros_like(inter_acc)
        card_acc[...] = jnp.zeros_like(card_acc)

    # In-kernel dtype handling: target.type(x.type()) (matches torch), then
    # fp32 accumulation.
    x = x_ref[0].astype(jnp.float32)                    # (C, T_HW)
    t = t_ref[0].astype(x_dtype).astype(jnp.float32)    # (C, T_HW)

    def accumulate(xv, tv):
        inter_acc[...] += xv * tv
        card_acc[...] += xv + tv

    t_hw = x.shape[-1]
    if rem_last == t_hw:
        # Block shape divides hw exactly: every block is fully valid.
        accumulate(x, t)
    else:
        # cdiv grid: lanes >= rem_last of the final block are unspecified
        # (garbage); zero them before accumulating (identity for both sums).
        @pl.when(s != last)
        def _():
            accumulate(x, t)

        @pl.when(s == last)
        def _():
            lane = lax.broadcasted_iota(jnp.int32, x.shape, 1)
            valid = lane < rem_last
            accumulate(jnp.where(valid, x, 0.0), jnp.where(valid, t, 0.0))

    @pl.when(s == last)
    def _():
        inter = jnp.sum(inter_acc[...], axis=-1, keepdims=True)   # (C, 1)
        card = jnp.sum(card_acc[...], axis=-1, keepdims=True)     # (C, 1)
        out_ref[0, :, 0:1] = inter
        out_ref[0, :, 1:2] = card


def _sublane_rows(rows, itemsize):
    """Rows rounded up to the sublane packing (8 f32, 16 bf16/f16, 32 int8)."""
    pack = _SUBLANE * max(1, 4 // int(itemsize))
    return ((rows + pack - 1) // pack) * pack


def _choose_spatial_tile(c, hw, x_itemsize, t_itemsize,
                         target_block_bytes=2 * 1024 * 1024,
                         vmem_budget_bytes=26 * 1024 * 1024):
    """Pick the spatial tile (lane multiple, no divisibility requirement).

    Returns (t_hw, rem_last).  rem_last == t_hw means no tail masking needed.
    """
    hw_chunks = pl.cdiv(hw, _LANE)

    # Physical bytes per 128-lane column of the resident VMEM working set.
    per_chunk = _LANE * (
        2 * _sublane_rows(c, x_itemsize) * x_itemsize      # x double buffer
        + 2 * _sublane_rows(c, t_itemsize) * t_itemsize    # target double buffer
        + 2 * _sublane_rows(c, 4) * 4)                     # two fp32 accumulators
    budget_chunks = max(1, vmem_budget_bytes // per_chunk)

    # Per-step DMA target (~1-2 MiB per x block).
    per_chunk_x = _LANE * c * x_itemsize
    target_chunks = max(1, target_block_bytes // per_chunk_x)

    chunks = int(min(budget_chunks, target_chunks, hw_chunks))
    if chunks >= hw_chunks:
        # Whole spatial extent fits in one block: use the exact (full) extent.
        return hw, hw
    t_hw = chunks * _LANE
    s_blocks = pl.cdiv(hw, t_hw)
    rem_last = hw - (s_blocks - 1) * t_hw
    return t_hw, rem_last


def dice_loss_both_weighted(x, target, weight, *,
                            target_block_bytes=2 * 1024 * 1024,
                            vmem_budget_bytes=26 * 1024 * 1024):
    """Pallas equivalent of the PyTorch `dice_loss_both_weighted.forward`.

    x, target: (N, C, *spatial). weight: scalar. Returns a scalar in x.dtype.
    """
    n, c = x.shape[0], x.shape[1]
    hw = 1
    for d in x.shape[2:]:
        hw *= d

    # Metadata-only reshapes (contiguous): no extra HBM pass.
    x3 = x.reshape(n, c, hw)
    t3 = target.reshape(n, c, hw)

    t_hw, rem_last = _choose_spatial_tile(
        c, hw, x.dtype.itemsize, target.dtype.itemsize,
        target_block_bytes=target_block_bytes,
        vmem_budget_bytes=vmem_budget_bytes)
    s_blocks = pl.cdiv(hw, t_hw)

    kernel = functools.partial(_dice_partials_kernel, x_dtype=x.dtype,
                               rem_last=rem_last)

    bytes_accessed = int(
        n * c * hw * (x.dtype.itemsize + target.dtype.itemsize) + n * c * 2 * 4)

    partials = pl.pallas_call(
        kernel,
        out_shape=jax.ShapeDtypeStruct((n, c, 2), jnp.float32),
        grid_spec=pltpu.PrefetchScalarGridSpec(
            num_scalar_prefetch=0,
            grid=(n, s_blocks),
            in_specs=[
                pl.BlockSpec((1, c, t_hw), lambda i, s: (i, 0, s)),
                pl.BlockSpec((1, c, t_hw), lambda i, s: (i, 0, s)),
            ],
            out_specs=pl.BlockSpec((1, c, 2), lambda i, s: (i, 0, 0)),
            scratch_shapes=[
                pltpu.VMEM((c, t_hw), jnp.float32),
                pltpu.VMEM((c, t_hw), jnp.float32),
            ],
        ),
        compiler_params=pltpu.CompilerParams(
            dimension_semantics=("parallel", "arbitrary"),
            vmem_limit_bytes=32 * 1024 * 1024,
        ),
        cost_estimate=pl.CostEstimate(
            flops=int(4 * n * c * hw),
            transcendentals=0,
            bytes_accessed=bytes_accessed),
    )(x3, t3)

    # Tiny epilogue in plain JAX: combine per-batch partials into the loss.
    intersection = jnp.sum(partials[:, :, 0], axis=0)   # (C,)
    cardinality = jnp.sum(partials[:, :, 1], axis=0)    # (C,)
    dice = 2.0 * intersection / (cardinality + EPS)
    w = jnp.asarray(weight, dtype=jnp.float32)
    total = (1.0 - w) * (1.0 - jnp.min(dice)) + w * (1.0 - jnp.mean(dice))
    # NOTE: sums are accumulated in fp32 even for fp16/bf16 inputs (more
    # accurate than torch's native-dtype accumulation).
    return total.astype(x.dtype)


def _reference(x, target, weight):
    t = target.astype(x.dtype)
    x32 = x.astype(jnp.float32)
    t32 = t.astype(jnp.float32)
    dims = (0,) + tuple(range(2, t32.ndim))
    intersection = jnp.sum(x32 * t32, axis=dims)
    cardinality = jnp.sum(x32 + t32, axis=dims)
    dice = 2.0 * intersection / (cardinality + EPS)
    total = (1.0 - weight) * (1.0 - jnp.min(dice)) + weight * (1.0 - jnp.mean(dice))
    return total.astype(x.dtype)


if __name__ == "__main__":
    key = jax.random.PRNGKey(0)
    k1, k2, k3, k4 = jax.random.split(key, 4)

    # Case 1: standard small segmentation shape (single-block path).
    N, C, H, W = 2, 4, 16, 16
    x = jax.nn.softmax(jax.random.normal(k1, (N, C, H, W), dtype=jnp.float32), axis=1)
    labels = jax.random.randint(k2, (N, H, W), 0, C)
    target = jax.nn.one_hot(labels, C, axis=1, dtype=jnp.float32)  # (N, C, H, W)
    weight = 0.7

    loss = jax.block_until_ready(dice_loss_both_weighted(x, target, weight))
    ref = _reference(x, target, weight)
    assert loss.dtype == x.dtype, (loss.dtype, x.dtype)
    assert jnp.allclose(loss.astype(jnp.float32), ref.astype(jnp.float32),
                        atol=1e-5, rtol=1e-5), (loss, ref)

    # Case 2: non-128-multiple spatial size with a forced-small tile to
    # exercise the cdiv grid + in-kernel tail-masking path.
    N2, C2, H2, W2 = 2, 4, 16, 17
    x2 = jax.nn.softmax(jax.random.normal(k3, (N2, C2, H2, W2), dtype=jnp.float32), axis=1)
    labels2 = jax.random.randint(k4, (N2, H2, W2), 0, C2)
    target2 = jax.nn.one_hot(labels2, C2, axis=1, dtype=jnp.float32)
    loss2 = jax.block_until_ready(
        dice_loss_both_weighted(x2, target2, 0.3, target_block_bytes=512))
    ref2 = _reference(x2, target2, 0.3)
    assert jnp.allclose(loss2.astype(jnp.float32), ref2.astype(jnp.float32),
                        atol=1e-5, rtol=1e-5), (loss2, ref2)

    print("KERNEL_OK")
</pallas_src>

<mosaic_0001>
module attributes {stable_mosaic.version = 11 : i64} {
  func.func @_dice_partials_kernel(%arg0: i32, %arg1: i32, %arg2: memref<1x4x256xf32, #tpu.memory_space<vmem>>, %arg3: memref<1x4x256xf32, #tpu.memory_space<vmem>>, %arg4: memref<1x4x2xf32, #tpu.memory_space<vmem>>, %arg5: memref<4x256xf32, #tpu.memory_space<vmem>>, %arg6: memref<4x256xf32, #tpu.memory_space<vmem>>) attributes {dimension_semantics = [#tpu.dimension_semantics<parallel>, #tpu.dimension_semantics<arbitrary>], iteration_bounds = array<i64: 2, 1>, scalar_prefetch = 0 : i64, scratch_operands = 2 : i64, tpu.core_type = #tpu.core_type<tc>, window_params = [{transform_indices = @transform_0, window_bounds = array<i64: 1, 4, 256>}, {transform_indices = @transform_1, window_bounds = array<i64: 1, 4, 256>}, {transform_indices = @transform_2, window_bounds = array<i64: 1, 4, 2>}]} {
    %c0_i32 = arith.constant 0 : i32
    %0 = arith.cmpi eq, %arg1, %c0_i32 : i32
    %1 = arith.extui %0 : i1 to i32
    %c0_i32_0 = arith.constant 0 : i32
    %2 = arith.cmpi ne, %1, %c0_i32_0 : i32
    scf.if %2 {
      %cst = arith.constant 0.000000e+00 : f32
      %18 = vector.broadcast %cst : f32 to vector<4x256xf32>
      %c0_16 = arith.constant 0 : index
      %c0_17 = arith.constant 0 : index
      %19 = vector.load %arg5[%c0_16, %c0_17] : memref<4x256xf32, #tpu.memory_space<vmem>>, vector<4x256xf32>
      tpu.vector_store %arg5[%c0_16, %c0_17], %18 {strides = array<i32>} : memref<4x256xf32, #tpu.memory_space<vmem>>, vector<4x256xf32>,
      %cst_18 = arith.constant 0.000000e+00 : f32
      %20 = vector.broadcast %cst_18 : f32 to vector<4x256xf32>
      %c0_19 = arith.constant 0 : index
      %c0_20 = arith.constant 0 : index
      %21 = vector.load %arg6[%c0_19, %c0_20] : memref<4x256xf32, #tpu.memory_space<vmem>>, vector<4x256xf32>
      tpu.vector_store %arg6[%c0_19, %c0_20], %20 {strides = array<i32>} : memref<4x256xf32, #tpu.memory_space<vmem>>, vector<4x256xf32>,
    } else {
    }
    %c0 = arith.constant 0 : index
    %c0_1 = arith.constant 0 : index
    %c0_2 = arith.constant 0 : index
    %3 = vector.load %arg2[%c0, %c0_1, %c0_2] : memref<1x4x256xf32, #tpu.memory_space<vmem>>, vector<1x4x256xf32>
    %4 = vector.shape_cast %3 : vector<1x4x256xf32> to vector<4x256xf32>
    %c0_3 = arith.constant 0 : index
    %c0_4 = arith.constant 0 : index
    %c0_5 = arith.constant 0 : index
    %5 = vector.load %arg3[%c0_3, %c0_4, %c0_5] : memref<1x4x256xf32, #tpu.memory_space<vmem>>, vector<1x4x256xf32>
    %6 = vector.shape_cast %5 : vector<1x4x256xf32> to vector<4x256xf32>
    %c0_6 = arith.constant 0 : index
    %c0_7 = arith.constant 0 : index
    %7 = vector.load %arg5[%c0_6, %c0_7] : memref<4x256xf32, #tpu.memory_space<vmem>>, vector<4x256xf32>
    %8 = arith.mulf %4, %6 : vector<4x256xf32>
    %9 = arith.addf %7, %8 : vector<4x256xf32>
    %c0_8 = arith.constant 0 : index
    %c0_9 = arith.constant 0 : index
    %10 = vector.load %arg5[%c0_8, %c0_9] : memref<4x256xf32, #tpu.memory_space<vmem>>, vector<4x256xf32>
    tpu.vector_store %arg5[%c0_8, %c0_9], %9 {strides = array<i32>} : memref<4x256xf32, #tpu.memory_space<vmem>>, vector<4x256xf32>,
    %c0_10 = arith.constant 0 : index
    %c0_11 = arith.constant 0 : index
    %11 = vector.load %arg6[%c0_10, %c0_11] : memref<4x256xf32, #tpu.memory_space<vmem>>, vector<4x256xf32>
    %12 = arith.addf %4, %6 : vector<4x256xf32>
    %13 = arith.addf %11, %12 : vector<4x256xf32>
    %c0_12 = arith.constant 0 : index
    %c0_13 = arith.constant 0 : index
    %14 = vector.load %arg6[%c0_12, %c0_13] : memref<4x256xf32, #tpu.memory_space<vmem>>, vector<4x256xf32>
    tpu.vector_store %arg6[%c0_12, %c0_13], %13 {strides = array<i32>} : memref<4x256xf32, #tpu.memory_space<vmem>>, vector<4x256xf32>,
    %c0_i32_14 = arith.constant 0 : i32
    %15 = arith.cmpi eq, %arg1, %c0_i32_14 : i32
    %16 = arith.extui %15 : i1 to i32
    %c0_i32_15 = arith.constant 0 : i32
    %17 = arith.cmpi ne, %16, %c0_i32_15 : i32
    scf.if %17 {
      %c0_16 = arith.constant 0 : index
      %c0_17 = arith.constant 0 : index
      %18 = vector.load %arg5[%c0_16, %c0_17] : memref<4x256xf32, #tpu.memory_space<vmem>>, vector<4x256xf32>
      %cst = arith.constant dense<0.000000e+00> : vector<4xf32>
      %19 = vector.multi_reduction <add>, %18, %cst [1] : vector<4x256xf32> to vector<4xf32>
      %20 = vector.shape_cast %19 : vector<4xf32> to vector<4x1xf32>
      %c0_18 = arith.constant 0 : index
      %c0_19 = arith.constant 0 : index
      %21 = vector.load %arg6[%c0_18, %c0_19] : memref<4x256xf32, #tpu.memory_space<vmem>>, vector<4x256xf32>
      %cst_20 = arith.constant dense<0.000000e+00> : vector<4xf32>
      %22 = vector.multi_reduction <add>, %21, %cst_20 [1] : vector<4x256xf32> to vector<4xf32>
      %23 = vector.shape_cast %22 : vector<4xf32> to vector<4x1xf32>
      %c0_21 = arith.constant 0 : index
      %c0_22 = arith.constant 0 : index
      %c0_23 = arith.constant 0 : index
      %24 = vector.load %arg4[%c0_21, %c0_22, %c0_23] : memref<1x4x2xf32, #tpu.memory_space<vmem>>, vector<1x4x1xf32>
      %25 = vector.shape_cast %24 : vector<1x4x1xf32> to vector<4x1xf32>
      %26 = vector.shape_cast %20 : vector<4x1xf32> to vector<1x4x1xf32>
      tpu.vector_store %arg4[%c0_21, %c0_22, %c0_23], %26 {strides = array<i32>} : memref<1x4x2xf32, #tpu.memory_space<vmem>>, vector<1x4x1xf32>,
      %c0_24 = arith.constant 0 : index
      %c0_25 = arith.constant 0 : index
      %c1 = arith.constant 1 : index
      %27 = vector.load %arg4[%c0_24, %c0_25, %c1] : memref<1x4x2xf32, #tpu.memory_space<vmem>>, vector<1x4x1xf32>
      %28 = vector.shape_cast %27 : vector<1x4x1xf32> to vector<4x1xf32>
      %29 = vector.shape_cast %23 : vector<4x1xf32> to vector<1x4x1xf32>
      tpu.vector_store %arg4[%c0_24, %c0_25, %c1], %29 {strides = array<i32>} : memref<1x4x2xf32, #tpu.memory_space<vmem>>, vector<1x4x1xf32>,
    } else {
    }
    return
  }
  func.func @transform_0(%arg0: i32, %arg1: i32) -> (i32, i32, i32) {
    %c0_i32 = arith.constant 0 : i32
    %c0_i32_0 = arith.constant 0 : i32
    return %arg0, %c0_i32, %arg1 : i32, i32, i32
  }
  func.func @transform_1(%arg0: i32, %arg1: i32) -> (i32, i32, i32) {
    %c0_i32 = arith.constant 0 : i32
    %c0_i32_0 = arith.constant 0 : i32
    return %arg0, %c0_i32, %arg1 : i32, i32, i32
  }
  func.func @transform_2(%arg0: i32, %arg1: i32) -> (i32, i32, i32) {
    %c0_i32 = arith.constant 0 : i32
    %c0_i32_0 = arith.constant 0 : i32
    %c0_i32_1 = arith.constant 0 : i32
    return %arg0, %c0_i32, %c0_i32_0 : i32, i32, i32
  }
}

</mosaic_0001>

<bundles_post_ra>
// kernel: tpu_custom_call.1
= control target key start
LH: loop header
LB: loop body
LE: loop exit
PB: predicated region body
PF: predicated region fallthrough
CT: control target
= control target key end

     0   :  { %7 = vsyncpa [#allocation5], 0  ;;  %s747_s0 = inlined_call_operand.hbm [shape: f32[2,4,256], index: 0, kind: input, shape index: {}]   ;;  %s748_s1 = inlined_call_operand.hbm [shape: f32[2,4,256], index: 1, kind: input, shape index: {}]   ;;  %s749_s2 = inlined_call_operand.vmem [shape: f32[2,4,2], index: 2, kind: output, shape index: {}]  }
   0x1   :  { %9 = vsyncpa [#allocation5 + $0x1], 0 }
   0x2   :  { %10 = vsyncpa [#allocation7], 0 }
   0x3   :  { %12 = vsyncpa [#allocation7 + $0x1], 0  ;;  %s575_s9 = smov 0   ;;  %s577_s10 = smov 0  }
   0x4   :  { %s579_s11 = smov 0   ;;  %s581_s12 = smov 0  }
   0x5   :  { %s583_s13 = smov 0   ;;  %s585_s14 = smov 0  }
   0x6 LB: > { %s364_s15 = sadd.s32 4294967295, %s556_s14   ;;  %s30_s16 = sadd.s32 1, %s552_s13  ;;  %s556_s14 = sphi %s585_s14, %s18_s14   ;;  %s552_s13 = sphi %s583_s13, %s763_s13   ;;  %s548_s12 = sphi %s581_s12, %s762_s12   ;;  %s544_s11 = sphi %s579_s11, %s761_s11   ;;  %s540_s10 = sphi %s577_s10, %s760_s10   ;;  %s536_s9 = sphi %s575_s9, %s759_s9  }
   0x7   : > { %p32_p0 = scmp.ge.s32.totalorder %s30_s16, 2  ;;  %s39_s17 = sadd.s32 1, %s544_s11 }
   0x8   : > { %p46_p1 = scmp.ne.s32.totalorder %s544_s11, %s540_s10  ;;  %p47_p2 = scmp.eq.s32.totalorder %s556_s14, 0 }
   0x9   : > { %s765_s16 = smov (%p32_p0, %s30_s16), 0  ;;  %p52_p4 = scmp.ne.s32.totalorder %s540_s10, %s536_s9 }
   0xa   : > { %p611_p3 = por %p47_p2, %p46_p1  ;;  %s34_s19 = ssub.s32 %s552_s13, %s765_s16 }
   0xb   : > { %p53_p5 = scmp.eq.s32.totalorder %s364_s15, 0  ;;  %p37_p6 = scmp.eq.s32.totalorder %s34_s19, 0 }
   0xc   : > { %p393_p8 = scmp.lt.s32.totalorder %s556_s14, 2  ;;  %s627_s22 = sand.u32 1, %s544_s11  }
   0xd   : > { %p618_p7 = por %p53_p5, %p52_p4  ;;  %s380_s23 = sshll.u32 %s552_s13, 7 }
   0xe   : > { %s624_s21 = scalar_select %p37_p6, %s544_s11, %s39_s17  }
   0xf   : > { %s752_s20 = scalar_select %p618_p7, 1, 0 }
  0x10   : > { %s368_s24 = sshll.u32 %s627_s22, 3  ;;  %s636_s27 = scalar_lea.hbm %s747_s0, %s380_s23 }
  0x11   : > { %s134_s28 = scalar_lea.vmem [#allocation4], %s368_s24  ;;  %p642_p9 = pnand %p393_p8, %p611_p3 }
  0x12   : > { %s144_s29 = sshll.u32 %s134_s28, 4  ;;  %s131_s3 = scalar_lea.sflag [#allocation5], %s627_s22  ;;  %s646_s29 = int_to_ptr.vmem [resolvable:$true] %s144_s29 }
  0x13   : > { %s442_s4 = scalar_lea.hbm %s636_s27, 128  ;;  %p444_p13 = pneg %p642_p9 }
  0x14   : > { %p443_p12 = scmp.ne.s32.totalorder %s636_s27, %s442_s4  ;;  %s447_s7 = scalar_lea.hbm %s747_s0, 256 }
  0x15   : > { %p448_p2 = scmp.lt.u32.totalorder %s636_s27, %s747_s0  ;;  %p449_p3 = scmp.lt.u32.totalorder %s447_s7, %s442_s4 }
  0x16   : > { %p445_p0 = pnand %p444_p13, %p443_p12  ;;  %p451_p5 = scmp.lt.u32.totalorder %s442_s4, %s636_s27 }
  0x17   : > { %p450_p4 = por %p449_p3, %p448_p2 }
  0x18   : > { %p446_p1 = pneg %p445_p0 }
  0x19   : > { %p452_p6 = por %p451_p5, %p450_p4 }
  0x1b   : > { %p453_p8 = pnand %p452_p6, %p446_p1 }
  0x1d   : > { %456 = shalt.err (!%p453_p8)
}
  0x1e   : > { %s457_s15 = scalar_lea.vmem %s646_s29, 128  ;;  %s558_s17 = smov [#allocation4]  }
  0x1f   : > { %p458_p12 = scmp.ne.s32.totalorder %s646_s29, %s457_s15  ;;  %s462_s18 = sshll.u32 %s558_s17, 4  ;;  %s463_s18 = int_to_ptr.vmem [resolvable:$false] %s462_s18 }
  0x20   : > { %s464_s19 = scalar_lea.vmem %s463_s18, 256  ;;  %p465_p11 = scmp.lt.s32.totalorder %s646_s29, %s463_s18 }
  0x21   : > { %p460_p0 = pnand %p458_p12, %p444_p13  ;;  %p466_p2 = scmp.lt.s32.totalorder %s464_s19, %s457_s15 }
  0x23   : > { %p461_p10 = pneg %p460_p0  ;;  %p467_p3 = por %p466_p2, %p465_p11 }
  0x25   : > { %p468_p4 = pnand %p467_p3, %p461_p10 }
  0x27   : > { %471 = shalt.err (!%p468_p4)
}
  0x28   : > { %389 = dma.hbm_to_vmem [thread:$0]  (!%p642_p9), %s636_s27, 128, %s646_s29, %s131_s3  }
  0x29   : > { %p754_p1 = scmp.lt.s32.totalorder %s556_s14, 3  ;;  %p755_p5 = scmp.ge.s32.totalorder %s556_s14, 1 }
  0x2a   : > { %s689_s4 = scalar_lea.hbm %s748_s1, %s380_s23  ;;  %s155_s5 = scalar_lea.vmem [#allocation6], %s368_s24 }
  0x2b   : > { %p680_p6 = pnand %p755_p5, %p754_p1  ;;  %s165_s6 = sshll.u32 %s155_s5, 4  ;;  %s166_s6 = int_to_ptr.vmem [resolvable:$true] %s165_s6 }
  0x2c   : > { %s152_s27 = scalar_lea.sflag [#allocation7], %s627_s22  ;;  %s472_s29 = scalar_lea.hbm %s689_s4, 128 }
  0x2d   : > { %s756_s25 = scalar_select %p680_p6, 1, 0 }
  0x2e   : > { %p473_p10 = scmp.ne.s32.totalorder %s689_s4, %s472_s29  ;;  %s477_s23 = scalar_lea.hbm %s748_s1, 256 }
  0x2f   : > { %p478_p12 = scmp.lt.u32.totalorder %s689_s4, %s748_s1  ;;  %p479_p0 = scmp.lt.u32.totalorder %s477_s23, %s472_s29 }
  0x30   : > { %p475_p11 = pnand %p473_p10, %p444_p13  ;;  %p481_p3 = scmp.lt.u32.totalorder %s472_s29, %s689_s4 }
  0x31   : > { %p480_p2 = por %p479_p0, %p478_p12 }
  0x32   : > { %p476_p8 = pneg %p475_p11 }
  0x33   : > { %p482_p4 = por %p481_p3, %p480_p2 }
  0x35   : > { %p483_p1 = pnand %p482_p4, %p476_p8 }
  0x37   : > { %486 = shalt.err (!%p483_p1)
}
  0x38   : > { %s487_s22 = scalar_lea.vmem %s166_s6, 128  ;;  %s559_s24 = smov [#allocation6]  }
  0x39   : > { %p488_p5 = scmp.ne.s32.totalorder %s166_s6, %s487_s22  ;;  %s492_s15 = sshll.u32 %s559_s24, 4  ;;  %s493_s15 = int_to_ptr.vmem [resolvable:$false] %s492_s15 }
  0x3a   : > { %s494_s17 = scalar_lea.vmem %s493_s15, 256  ;;  %p495_p7 = scmp.lt.s32.totalorder %s166_s6, %s493_s15 }
  0x3b   : > { %p490_p10 = pnand %p488_p5, %p444_p13  ;;  %p496_p6 = scmp.lt.s32.totalorder %s494_s17, %s487_s22 }
  0x3d   : > { %p491_p11 = pneg %p490_p10  ;;  %p497_p0 = por %p496_p6, %p495_p7 }
  0x3f   : > { %p498_p12 = pnand %p497_p0, %p491_p11 }
  0x41   : > { %501 = shalt.err (!%p498_p12)
}
  0x42   : > { %392 = dma.hbm_to_vmem [thread:$0]  (!%p642_p9), %s689_s4, 128, %s166_s6, %s152_s27  }
  0x43   : > { %p757_p8 = scmp.ne.s32.totalorder %s756_s25, 0 }
  0x44   : > { %s176_s18 = sand.u32 (!%p757_p8), 1, %s540_s10   ;;  %p758_p13 = scmp.ne.s32.totalorder (!%p757_p8), %s752_s20, 0 }
  0x45   : > { %174 = sbr.rel (%p757_p8) target bundleno = 234 (0xea), region = 28  ;;  %s375_s19 = sshll.u32 (!%p757_p8), %s176_s18, 3 }
  0x46   : > { %s177_s26 = scalar_lea.sflag (!%p757_p8), [#allocation5], %s176_s18  ;;  %s180_s28 = scalar_lea.vmem (!%p757_p8), [#allocation4], %s375_s19 }
  0x4c   : > { %527 = dma.done.wait (%p758_p13), %s177_s26, 128  }
  0x4d   : > { %529 = vsyncadd (%p758_p13), %s177_s26, 4294967168  ;;  %s186_s5 = scalar_lea.sflag [#allocation7], %s176_s18  ;;  %s189_s29 = scalar_lea.vmem [#allocation6], %s375_s19 }
  0x4e   : > { %531 = dma.done.wait (%p758_p13), %s186_s5, 128  }
  0x4f   : > { %533 = vsyncadd (%p758_p13), %s186_s5, 4294967168  ;;  %v226_v0 = vld [vmem:[%s180_s28] sm:$0xff]  ;;  %v227_v1 = vld [vmem:[%s189_s29] sm:$0xff]  ;;  %vm243_vm0 = vcmask 1043456   ;;  %p216_p7 = scmp.lt.s32.totalorder %s548_s12, 1  ;;  %vm258_vm1 = vcmask 3072  }
  0x50   : > { %v229_v2 = vmul.f32 %v227_v1, %v226_v0  ;;  %v233_v3 = vadd.f32 %v227_v1, %v226_v0  ;;  %vm260_vm2 = vcmask 11272  }
  0x51   : > { %s767_s12 = smov (!%p216_p7, %s548_s12), 1 }
  0x52   : > { %v241_v4 = vcombine.high %v229_v2, %v229_v2  ;;  %v244_v5 = vsel %vm243_vm0, %v229_v2, 0.0  ;;  %v251_v6 = vcombine.high %v233_v3, %v233_v3  ;;  %v253_v8 = vsel %vm243_vm0, %v233_v3, 0.0  ;;  %s377_s20 = sshll.u32 %s767_s12, 2 }
  0x53   : > { %s219_s4 = scalar_lea.vmem %s749_s2, %s377_s20 }
  0x54   : > { %v245_v7 = vsel %vm243_vm0, %v241_v4, 0.0  ;;  %v254_v9 = vsel %vm243_vm0, %v251_v6, 0.0 }
  0x55   : > { %v246_v10 = vadd.f32 %v245_v7, %v244_v5  ;;  %v255_v11 = vadd.f32 %v254_v9, %v253_v8 }
  0x57   : > { %247 = vadd.xlane.f32.xlu0 %v246_v10 }
  0x5b   : > { %256 = vadd.xlane.f32.xlu0 %v255_v11 }
  0xe4   : > { %v248_v12 = vpop.xlane.xlu0 %247 }
  0xe5   : > { %259 = vst.msk [vmem:[%s219_s4] sm:$0xf] %vm258_vm1, %v248_v12 }
  0xe8   : > { %v257_v13 = vpop.xlane.xlu0 %256 }
  0xe9   : > { %261 = vst.msk [vmem:[%s219_s4] sm:$0xf] %vm260_vm2, %v257_v13 }
  0xea PF: > { %s18_s14 = sadd.s32 1, %s556_s14   ;;  %s759_s9 = smov %s540_s10 }
  0xeb   : > { %p15_p9 = scmp.ge.s32.totalorder %s18_s14, 4   ;;  %s760_s10 = smov %s544_s11 }
  0xec   : > { %s761_s11 = smov %s624_s21  ;;  %s762_s12 = smov %s552_s13 }
  0xed   : > { %s763_s13 = smov %s765_s16  ;;  %17 = sbr.rel (!%p15_p9) target bundleno = 6 (0x6), region = 89 }
  0xf4   :  { %281 = vsyncpa [#allocation5], 1 }
  0xf5   :  { %283 = vsyncpa [#allocation5 + $0x1], 1 }
  0xf6   :  { %284 = vsyncpa [#allocation7], 1 }
  0xf7   :  { %286 = vsyncpa [#allocation7 + $0x1], 1 }

</bundles_post_ra>
